<compile_context>
chip_gen: v7x
topology: tpu7x:2x2x1
jax: 0.10.0
libtpu: 0.0.40
codegen_flags: <defaults>
</compile_context>

<pallas_src>
import functools

import jax
import jax.numpy as jnp
from jax.experimental import pallas as pl
from jax.experimental.pallas import tpu as pltpu

LN_EPS = 1e-5


def _output_layer_kernel(x_ref, w1_ref, g_ref, gv_ref, o_ref, *, inv_cnt):
    # x_ref block: (1, K_pad, N_pad)  rows = [ci*T + t ...,  bias/indicator, 0-pad]
    x = x_ref[0]                                                   # (K_pad, N_pad)

    # tconv1 (T,1) conv + bias, fused into one MXU matmul.
    x_t1 = jnp.dot(w1_ref[...], x,
                   preferred_element_type=jnp.float32)             # (C, N_pad)

    # LayerNorm([N, C]) statistics over the whole per-batch slab, one pass.
    # Padded lanes of x_t1 are exactly zero (zero x rows, zero indicator),
    # so plain full-slab sums divided by the true count C*N are exact.
    s = jnp.sum(x_t1)
    ss = jnp.sum(x_t1 * x_t1)
    mean = s * inv_cnt
    var = ss * inv_cnt - mean * mean
    inv = jax.lax.rsqrt(var + LN_EPS)

    # Fully folded LayerNorm * tconv2 * fc tail.
    S = jnp.sum(g_ref[...] * x_t1, axis=0, keepdims=True)          # (1, N_pad)
    gv = gv_ref[...]                                               # (2, N_pad)
    gsum = gv[0:1, :]
    v = gv[1:2, :]
    o_ref[0] = inv * (S - mean * gsum) + v                         # (1, N_pad)


def traffic_model_forward(x_btnc, params):
    """x_btnc: (B, T, N, C) float32 -> (B, 1, 1, N) float32."""
    B, T, N, C = x_btnc.shape
    f32 = jnp.float32
    CT = C * T
    N_pad = ((N + 127) // 128) * 128          # lane-dense node axis
    K_pad = ((CT + 1 + 7) // 8) * 8           # sublane-aligned contraction axis

    # TrafficModel permutes to (B, C, T, N) before the OutputLayer.
    # NOTE: this transpose is an extra HBM round-trip; choose the upstream
    # layout as (B, C, T, N) if possible to avoid it at scale.
    x_bctn = jnp.transpose(x_btnc, (0, 3, 1, 2)).reshape(B, CT, N).astype(f32)
    x_aug = jnp.zeros((B, K_pad, N_pad), f32)
    x_aug = x_aug.at[:, :CT, :N].set(x_bctn)
    x_aug = x_aug.at[:, CT, :N].set(1.0)      # bias / valid-lane indicator row

    # tconv1 weight + bias fused into one (C, K_pad) slab.
    w1_aug = jnp.zeros((C, K_pad), f32)
    w1_aug = w1_aug.at[:, :CT].set(params["w1"].reshape(C, CT))
    w1_aug = w1_aug.at[:, CT].set(params["b1"])

    # Fold fc into tconv2, then fold gamma/beta.
    w_comb = params["wfc"] @ params["w2"]                           # (C,)
    b_comb = params["wfc"] @ params["b2"] + params["bfc"]           # ()
    G = jnp.zeros((C, N_pad), f32)
    G = G.at[:, :N].set(w_comb[:, None] * params["gamma"].T)        # (C, N_pad)
    gsum = jnp.sum(G, axis=0)                                       # (N_pad,)
    v = jnp.zeros((N_pad,), f32)
    v = v.at[:N].set(params["beta"] @ w_comb + b_comb)              # (N_pad,)
    gv = jnp.stack([gsum, v], axis=0)                               # (2, N_pad)

    kernel = functools.partial(_output_layer_kernel, inv_cnt=1.0 / (C * N))

    out = pl.pallas_call(
        kernel,
        out_shape=jax.ShapeDtypeStruct((B, 1, N_pad), jnp.float32),
        grid=(B,),
        in_specs=[
            pl.BlockSpec((1, K_pad, N_pad), lambda b: (b, 0, 0)),
            pl.BlockSpec((C, K_pad), lambda b: (0, 0)),
            pl.BlockSpec((C, N_pad), lambda b: (0, 0)),
            pl.BlockSpec((2, N_pad), lambda b: (0, 0)),
        ],
        out_specs=pl.BlockSpec((1, 1, N_pad), lambda b: (b, 0, 0)),
        compiler_params=pltpu.CompilerParams(
            dimension_semantics=("parallel",)),
    )(x_aug, w1_aug, G, gv)

    return out[:, :, :N].reshape(B, 1, 1, N)


def traffic_model_reference(x_btnc, params):
    """Pure-JAX reference mirroring the PyTorch OutputLayer semantics."""
    B, T, N, C = x_btnc.shape
    x = jnp.transpose(x_btnc, (0, 3, 1, 2))                         # (B, C, T, N)
    # tconv1: Conv2d(c, c, (T, 1))
    x_t1 = jnp.einsum("oct,bctn->bon", params["w1"], x) \
        + params["b1"][None, :, None]                               # (B, C, N)
    # LayerNorm([n, c]) on (B, 1, N, C)
    x_nc = jnp.transpose(x_t1, (0, 2, 1))                           # (B, N, C)
    mean = jnp.mean(x_nc, axis=(1, 2), keepdims=True)
    var = jnp.mean((x_nc - mean) ** 2, axis=(1, 2), keepdims=True)
    x_ln = (x_nc - mean) / jnp.sqrt(var + LN_EPS) \
        * params["gamma"][None] + params["beta"][None]              # (B, N, C)
    x_ln = jnp.transpose(x_ln, (0, 2, 1))                           # (B, C, N)
    # tconv2: Conv2d(c, c, (1, 1))
    x_t2 = jnp.einsum("oc,bcn->bon", params["w2"], x_ln) \
        + params["b2"][None, :, None]                               # (B, C, N)
    # fc: Conv2d(c, 1, 1)
    out = jnp.einsum("c,bcn->bn", params["wfc"], x_t2) + params["bfc"]
    return out.reshape(B, 1, 1, N)


def init_params(key, C, T, N):
    ks = jax.random.split(key, 8)
    return {
        # tconv1: Conv2d(C, C, (T, 1)) weight (C, C, T, 1) -> stored as (C, C, T)
        "w1": 0.1 * jax.random.normal(ks[0], (C, C, T), jnp.float32),
        "b1": 0.1 * jax.random.normal(ks[1], (C,), jnp.float32),
        # LayerNorm([N, C])
        "gamma": 1.0 + 0.1 * jax.random.normal(ks[2], (N, C), jnp.float32),
        "beta": 0.1 * jax.random.normal(ks[3], (N, C), jnp.float32),
        # tconv2: Conv2d(C, C, (1, 1))
        "w2": 0.1 * jax.random.normal(ks[4], (C, C), jnp.float32),
        "b2": 0.1 * jax.random.normal(ks[5], (C,), jnp.float32),
        # fc: Conv2d(C, 1, 1)
        "wfc": 0.1 * jax.random.normal(ks[6], (C,), jnp.float32),
        "bfc": 0.1 * jax.random.normal(ks[7], (), jnp.float32),
    }


if __name__ == "__main__":
    # Small shapes: batch=2, n_his (T)=8, num_nodes (N)=16, channels (C)=4
    B, T, N, C = 2, 8, 16, 4
    key = jax.random.PRNGKey(0)
    kx, kp = jax.random.split(key)
    x = jax.random.normal(kx, (B, T, N, C), jnp.float32)
    params = init_params(kp, C, T, N)

    out = traffic_model_forward(x, params)
    out = jax.block_until_ready(out)

    ref = traffic_model_reference(x, params)
    assert out.shape == (B, 1, 1, N), out.shape
    assert jnp.allclose(out, ref, atol=1e-4, rtol=1e-4), \
        float(jnp.max(jnp.abs(out - ref)))
    print("KERNEL_OK")
</pallas_src>

<mosaic_0001>
module attributes {stable_mosaic.version = 11 : i64} {
  func.func @_output_layer_kernel(%arg0: i32, %arg1: memref<1x40x128xf32, #tpu.memory_space<vmem>>, %arg2: memref<4x40xf32, #tpu.memory_space<vmem>>, %arg3: memref<4x128xf32, #tpu.memory_space<vmem>>, %arg4: memref<2x128xf32, #tpu.memory_space<vmem>>, %arg5: memref<1x1x128xf32, #tpu.memory_space<vmem>>) attributes {dimension_semantics = [#tpu.dimension_semantics<parallel>], iteration_bounds = array<i64: 2>, scalar_prefetch = 0 : i64, scratch_operands = 0 : i64, tpu.core_type = #tpu.core_type<tc>, window_params = [{transform_indices = @transform_0, window_bounds = array<i64: 1, 40, 128>}, {pipeline_mode = #tpu.pipeline_mode<synchronous>, transform_indices = @transform_1, window_bounds = array<i64: 4, 40>}, {pipeline_mode = #tpu.pipeline_mode<synchronous>, transform_indices = @transform_2, window_bounds = array<i64: 4, 128>}, {pipeline_mode = #tpu.pipeline_mode<synchronous>, transform_indices = @transform_3, window_bounds = array<i64: 2, 128>}, {transform_indices = @transform_4, window_bounds = array<i64: 1, 1, 128>}]} {
    %c0 = arith.constant 0 : index
    %c0_0 = arith.constant 0 : index
    %c0_1 = arith.constant 0 : index
    %0 = vector.load %arg1[%c0, %c0_0, %c0_1] : memref<1x40x128xf32, #tpu.memory_space<vmem>>, vector<1x40x128xf32>
    %1 = vector.shape_cast %0 : vector<1x40x128xf32> to vector<40x128xf32>
    %c0_2 = arith.constant 0 : index
    %c0_3 = arith.constant 0 : index
    %2 = vector.load %arg2[%c0_2, %c0_3] : memref<4x40xf32, #tpu.memory_space<vmem>>, vector<4x40xf32>
    %cst = arith.constant dense<0.000000e+00> : vector<4x128xf32>
    %3 = tpu.matmul %2, %1, %cst {dimension_numbers = #tpu.dot_dimension_numbers<[1], [0], [0], [1], [0, 0, 1, 1], [], []>} : vector<4x40xf32>, vector<40x128xf32>, vector<4x128xf32> -> vector<4x128xf32>
    %4 = vector.shape_cast %3 : vector<4x128xf32> to vector<1x4x128xf32>
    %cst_4 = arith.constant dense<0.000000e+00> : vector<1xf32>
    %5 = vector.multi_reduction <add>, %4, %cst_4 [1, 2] : vector<1x4x128xf32> to vector<1xf32>
    %6 = vector.shape_cast %5 : vector<1xf32> to vector<1x1x1xf32>
    %7 = vector.extract %6[0, 0, 0] : f32 from vector<1x1x1xf32>
    %8 = arith.mulf %3, %3 : vector<4x128xf32>
    %9 = vector.shape_cast %8 : vector<4x128xf32> to vector<1x4x128xf32>
    %cst_5 = arith.constant dense<0.000000e+00> : vector<1xf32>
    %10 = vector.multi_reduction <add>, %9, %cst_5 [1, 2] : vector<1x4x128xf32> to vector<1xf32>
    %11 = vector.shape_cast %10 : vector<1xf32> to vector<1x1x1xf32>
    %12 = vector.extract %11[0, 0, 0] : f32 from vector<1x1x1xf32>
    %cst_6 = arith.constant 1.562500e-02 : f32
    %13 = arith.mulf %7, %cst_6 : f32
    %cst_7 = arith.constant 1.562500e-02 : f32
    %14 = arith.mulf %12, %cst_7 : f32
    %15 = arith.mulf %13, %13 : f32
    %16 = arith.subf %14, %15 : f32
    %cst_8 = arith.constant 9.99999974E-6 : f32
    %17 = arith.addf %16, %cst_8 : f32
    %18 = math.rsqrt %17 : f32
    %c0_9 = arith.constant 0 : index
    %c0_10 = arith.constant 0 : index
    %19 = vector.load %arg3[%c0_9, %c0_10] : memref<4x128xf32, #tpu.memory_space<vmem>>, vector<4x128xf32>
    %20 = arith.mulf %19, %3 : vector<4x128xf32>
    %cst_11 = arith.constant dense<0.000000e+00> : vector<128xf32>
    %21 = vector.multi_reduction <add>, %20, %cst_11 [0] : vector<4x128xf32> to vector<128xf32>
    %22 = vector.shape_cast %21 : vector<128xf32> to vector<1x128xf32>
    %c0_12 = arith.constant 0 : index
    %c0_13 = arith.constant 0 : index
    %23 = vector.load %arg4[%c0_12, %c0_13] : memref<2x128xf32, #tpu.memory_space<vmem>>, vector<2x128xf32>
    %24 = vector.extract_strided_slice %23 {offsets = [0, 0], sizes = [1, 128], strides = [1, 1]} : vector<2x128xf32> to vector<1x128xf32>
    %25 = vector.extract_strided_slice %23 {offsets = [1, 0], sizes = [1, 128], strides = [1, 1]} : vector<2x128xf32> to vector<1x128xf32>
    %26 = vector.broadcast %13 : f32 to vector<1x128xf32>
    %27 = arith.mulf %26, %24 : vector<1x128xf32>
    %28 = arith.subf %22, %27 : vector<1x128xf32>
    %29 = vector.broadcast %18 : f32 to vector<1x128xf32>
    %30 = arith.mulf %29, %28 : vector<1x128xf32>
    %31 = arith.addf %30, %25 : vector<1x128xf32>
    %c0_14 = arith.constant 0 : index
    %c0_15 = arith.constant 0 : index
    %c0_16 = arith.constant 0 : index
    %32 = vector.load %arg5[%c0_14, %c0_15, %c0_16] : memref<1x1x128xf32, #tpu.memory_space<vmem>>, vector<1x1x128xf32>
    %33 = vector.shape_cast %32 : vector<1x1x128xf32> to vector<1x128xf32>
    %34 = vector.shape_cast %31 : vector<1x128xf32> to vector<1x1x128xf32>
    tpu.vector_store %arg5[%c0_14, %c0_15, %c0_16], %34 {strides = array<i32>} : memref<1x1x128xf32, #tpu.memory_space<vmem>>, vector<1x1x128xf32>,
    return
  }
  func.func @transform_0(%arg0: i32) -> (i32, i32, i32) {
    %c0_i32 = arith.constant 0 : i32
    %c0_i32_0 = arith.constant 0 : i32
    %c0_i32_1 = arith.constant 0 : i32
    return %arg0, %c0_i32, %c0_i32_0 : i32, i32, i32
  }
  func.func @transform_1(%arg0: i32) -> (i32, i32) {
    %c0_i32 = arith.constant 0 : i32
    %c0_i32_0 = arith.constant 0 : i32
    %c0_i32_1 = arith.constant 0 : i32
    return %c0_i32, %c0_i32_0 : i32, i32
  }
  func.func @transform_2(%arg0: i32) -> (i32, i32) {
    %c0_i32 = arith.constant 0 : i32
    %c0_i32_0 = arith.constant 0 : i32
    %c0_i32_1 = arith.constant 0 : i32
    return %c0_i32, %c0_i32_0 : i32, i32
  }
  func.func @transform_3(%arg0: i32) -> (i32, i32) {
    %c0_i32 = arith.constant 0 : i32
    %c0_i32_0 = arith.constant 0 : i32
    %c0_i32_1 = arith.constant 0 : i32
    return %c0_i32, %c0_i32_0 : i32, i32
  }
  func.func @transform_4(%arg0: i32) -> (i32, i32, i32) {
    %c0_i32 = arith.constant 0 : i32
    %c0_i32_0 = arith.constant 0 : i32
    %c0_i32_1 = arith.constant 0 : i32
    return %arg0, %c0_i32, %c0_i32_0 : i32, i32, i32
  }
}

</mosaic_0001>

<bundles_post_ra>
// kernel: tpu_custom_call.1
= control target key start
LH: loop header
LB: loop body
LE: loop exit
PB: predicated region body
PF: predicated region fallthrough
CT: control target
= control target key end

     0   :  { %9 = vsyncpa [#allocation3], 0  ;;  %s922_s0 = inlined_call_operand.hbm [shape: f32[2,40,128], index: 0, kind: input, shape index: {}]   ;;  %s923_s1 = inlined_call_operand.hbm [shape: f32[4,40], index: 1, kind: input, shape index: {}]   ;;  %s924_s2 = inlined_call_operand.vmem [shape: f32[4,128], index: 2, kind: input, shape index: {}]   ;;  %s925_s3 = inlined_call_operand.vmem [shape: f32[2,128], index: 3, kind: input, shape index: {}]   ;;  %s926_s4 = inlined_call_operand.hbm [shape: f32[2,1,128], index: 4, kind: output, shape index: {}]  }
   0x1   :  { %11 = vsyncpa [#allocation3 + $0x1], 0 }
   0x2   :  { %12 = vsyncpa [#allocation6], 0 }
   0x3   :  { %13 = vsyncpa [#allocation4], 0 }
   0x4   :  { %15 = vsyncpa [#allocation4 + $0x1], 0  ;;  %s719_s15 = smov 0   ;;  %s721_s16 = smov 0  }
   0x5   :  { %s723_s17 = smov 0   ;;  %s725_s18 = smov 0  }
   0x6 LB: > { %s740_s19 = sadd.s32 4294967295, %s684_s18   ;;  %s447_s20 = sadd.s32 4294967294, %s684_s18   ;;  %s684_s18 = sphi %s725_s18, %s951_s18   ;;  %s680_s17 = sphi %s723_s17, %s950_s17   ;;  %s676_s16 = sphi %s721_s16, %s949_s16   ;;  %s672_s15 = sphi %s719_s15, %s948_s15  }
   0x7   : > { %s744_s21 = sadd.s32 1, %s684_s18   ;;  %s28_s22 = sadd.s32 1, %s680_s17 }
   0x8   : > { %s25_s23 = ssub.s32 %s684_s18, %s744_s21  ;;  %p35_p0 = scmp.ne.s32.totalorder %s680_s17, %s676_s16 }
   0x9   : > { %p26_p1 = scmp.eq.s32.totalorder %s25_s23, 0  ;;  %p36_p2 = scmp.eq.s32.totalorder %s684_s18, 0 }
   0xa   : > { %p41_p3 = scmp.ne.s32.totalorder %s676_s16, %s672_s15  ;;  %p927_p4 = scmp.eq.s32.totalorder %s740_s19, 0 }
   0xb   : > { %s756_s24 = scalar_select %p26_p1, %s680_s17, %s28_s22  }
   0xc   : > { %p758_p5 = por %p36_p2, %p35_p0  ;;  %p764_p6 = por %p927_p4, %p41_p3 }
   0xd   : > { %p128_p7 = scmp.eq.s32.totalorder %s740_s19, 1  ;;  %p134_p8 = scmp.eq.s32.totalorder %s447_s20, 1 }
   0xe   : > { %s933_s26 = scalar_select %p764_p6, 1, 0 }
   0xf   : > { %p448_p9 = scmp.ge.s32.totalorder %s684_s18, 1  ;;  %p141_p10 = scmp.lt.s32.totalorder %s684_s18, 3 }
  0x10   : > { %p771_p11 = por %p128_p7, %p35_p0  ;;  %p775_p12 = por %p134_p8, %p41_p3 }
  0x11   : > { %p779_p13 = pnand %p448_p9, %p141_p10  ;;  %s686_s30 = smov [#allocation5]  }
  0x12   : > { %s934_s27 = scalar_select %p771_p11, 1, 0 }
  0x13   : > { %s935_s28 = scalar_select %p775_p12, 1, 0 }
  0x14   : > { %s936_s29 = scalar_select %p779_p13, 1, 0 }
  0x15   : > { %p500_p2 = pneg %p779_p13  ;;  %s154_s5 = sshll.u32 %s686_s30, 4  ;;  %s155_s5 = int_to_ptr.vmem [resolvable:$true] %s154_s5 }
  0x16   : > { %p513_p4 = scmp.lt.s32.totalorder %s684_s18, 2  ;;  %p937_p0 = scmp.eq.s32.totalorder %s740_s19, 0 }
  0x17   : > { %s171_s7 = sand.u32 1, %s680_s17   ;;  %s556_s12 = scalar_lea.hbm %s923_s1, 64 }
  0x18   : > { %p789_p7 = pnand %p500_p2, %p937_p0  ;;  %p796_p3 = pnand %p513_p4, %p758_p5 }
  0x19   : > { %s483_s9 = smul.u32 40, %s171_s7  ;;  %p557_p8 = scmp.ne.s32.totalorder %s923_s1, %s556_s12 }
  0x1a   : > { %s939_s8 = scalar_select %p796_p3, 1, 0 }
  0x1b   : > { %p558_p9 = pneg %p789_p7  ;;  %p563_p4 = scmp.lt.u32.totalorder %s556_s12, %s923_s1 }
  0x1d   : > { %p559_p10 = pnand %p558_p9, %p557_p8 }
  0x1f   : > { %p560_p2 = pneg %p559_p10 }
  0x21   : > { %p565_p5 = pnand %p563_p4, %p560_p2 }
  0x23   : > { %568 = shalt.err (!%p565_p5)
}
  0x24   : > { %s569_s23 = scalar_lea.vmem %s155_s5, 64  ;;  %p577_p11 = scmp.lt.s32.totalorder %s155_s5, %s155_s5 }
  0x25   : > { %p570_p0 = scmp.ne.s32.totalorder %s155_s5, %s569_s23  ;;  %p578_p6 = scmp.lt.s32.totalorder %s569_s23, %s569_s23 }
  0x27   : > { %p572_p1 = pnand %p570_p0, %p558_p9  ;;  %p579_p13 = por %p578_p6, %p577_p11 }
  0x29   : > { %p573_p12 = pneg %p572_p1 }
  0x2b   : > { %p580_p3 = pnand %p579_p13, %p573_p12 }
  0x2d   : > { %583 = shalt.err (!%p580_p3)
}
  0x2e   : > { %503 = dma.hbm_to_vmem [thread:$0]  (!%p789_p7), %s923_s1, 64, %s155_s5, [#allocation6]  }
  0x2f   : > { %s484_s10 = smul.u32 640, %s684_s18  ;;  %s175_s11 = scalar_lea.vmem [#allocation2], %s483_s9 }
  0x30   : > { %s182_s12 = sshll.u32 %s175_s11, 4  ;;  %s824_s6 = scalar_lea.sflag [#allocation3], %s171_s7  ;;  %s817_s12 = int_to_ptr.vmem [resolvable:$true] %s182_s12 }
  0x31   : > { %s822_s20 = scalar_lea.hbm %s922_s0, %s484_s10  ;;  %p940_p11 = scmp.ne.s32.totalorder %s939_s8, 0 }
  0x32   : > { %s584_s22 = scalar_lea.hbm %s822_s20, 640  ;;  %s589_s23 = scalar_lea.hbm %s922_s0, 1280 }
  0x33   : > { %p585_p6 = scmp.ne.s32.totalorder %s822_s20, %s584_s22  ;;  %p586_p12 = pneg %p940_p11 }
  0x34   : > { %p590_p7 = scmp.lt.u32.totalorder %s822_s20, %s922_s0  ;;  %p591_p3 = scmp.lt.u32.totalorder %s589_s23, %s584_s22 }
  0x35   : > { %p587_p13 = pnand %p586_p12, %p585_p6  ;;  %p593_p9 = scmp.lt.u32.totalorder %s584_s22, %s822_s20 }
  0x36   : > { %p592_p8 = por %p591_p3, %p590_p7 }
  0x37   : > { %p588_p1 = pneg %p587_p13 }
  0x38   : > { %p594_p10 = por %p593_p9, %p592_p8 }
  0x3a   : > { %p595_p2 = pnand %p594_p10, %p588_p1 }
  0x3c   : > { %598 = shalt.err (!%p595_p2)
}
  0x3d   : > { %s599_s7 = scalar_lea.vmem %s817_s12, 640  ;;  %s687_s10 = smov [#allocation2]  }
  0x3e   : > { %p600_p4 = scmp.ne.s32.totalorder %s817_s12, %s599_s7  ;;  %s604_s11 = sshll.u32 %s687_s10, 4  ;;  %s605_s11 = int_to_ptr.vmem [resolvable:$false] %s604_s11 }
  0x3f   : > { %s606_s13 = scalar_lea.vmem %s605_s11, 1280  ;;  %p607_p6 = scmp.lt.s32.totalorder %s817_s12, %s605_s11 }
  0x40   : > { %p602_p5 = pnand %p600_p4, %p586_p12  ;;  %p608_p13 = scmp.lt.s32.totalorder %s606_s13, %s599_s7 }
  0x42   : > { %p603_p0 = pneg %p602_p5  ;;  %p609_p7 = por %p608_p13, %p607_p6 }
  0x44   : > { %p610_p3 = pnand %p609_p7, %p603_p0 }
  0x46   : > { %613 = shalt.err (!%p610_p3)
}
  0x47   : > { %s688_s14 = smov 128   ;;  %s689_s22 = smov 8  }
  0x48   : > { %507 = dma.hbm_to_vmem [thread:$0]  (!%p940_p11), %s822_s20, 640, %s817_s12, %s824_s6, %s688_s14, %s688_s14, %s689_s22  }
  0x49   : > { %p941_p12 = scmp.ne.s32.totalorder %s936_s29, 0 }
  0x4a   : > { %s855_s5 = sand.u32 (!%p941_p12), 1, %s676_s16   ;;  %p942_p1 = scmp.ne.s32.totalorder (!%p941_p12), %s933_s26, 0 }
  0x4b   : > { %194 = sbr.rel (%p941_p12) target bundleno = 606 (0x25e), region = 36  ;;  %s197_s23 = scalar_lea.sflag (!%p941_p12), [#allocation3], %s855_s5 }
  0x4c   : > { %s485_s9 = smul.u32 (!%p941_p12), 40, %s855_s5 }
  0x4e   : > { %s200_s25 = scalar_lea.vmem (!%p941_p12), [#allocation2], %s485_s9 }
  0x52   : > { %659 = dma.done.wait (%p942_p1), %s197_s23, 640  }
  0x53   : > { %661 = vsyncadd (%p942_p1), %s197_s23, 4294966656  ;;  %p943_p8 = scmp.eq.s32.totalorder %s740_s19, 0 }
  0x55   : > { %663 = dma.done.wait (%p943_p8), [#allocation6], 64   ;;  %p944_p11 = pmov %p943_p8 }
  0x56   : > { %v690_v0 = vmov 0.0|0.0   ;;  %vm691_vm0 = vmmov 0   ;;  %v692_v1 = vmov 0.0   ;;  %v228_v2 = vld [vmem:[%s200_s25] sm:$0xff]  ;;  %v229_v3 = vld [vmem:[%s200_s25 + $0x8] sm:$0xff]  ;;  %v230_v4 = vld [vmem:[%s200_s25 + $0x10] sm:$0xff] }
  0x57   : > { %665 = vsyncadd (%p944_p11), [#allocation6], 4294967232  ;;  %477 = vmatprep.subr.bf16.mxu0 %v690_v0  ;;  %474 = vmatprep.mubr.msk.f32.mxu0 %vm691_vm0, %v692_v1  ;;  %v478_v5 = vpack.c.bf16 %v229_v3, %v228_v2  ;;  %v231_v6 = vld [vmem:[%s200_s25 + $0x18] sm:$0xff]  ;;  %v232_v8 = vld [vmem:[%s200_s25 + $0x20] sm:$0xff]  ;;  %vm234_vm1 = vcmask 326656   ;;  %vm308_vm2 = vcmask 1043456  }
  0x58   : > { %v481_v7 = vpack.c.bf16 %v231_v6, %v230_v4  ;;  %v233_v9 = vld [vmem:[#allocation5] sm:$0xf]  ;;  %v338_v10 = vld [vmem:[%s924_s2] sm:$0xf]  ;;  %s455_s22 = sshll.u32 %s740_s19, 4  ;;  %s227_s9 = scalar_lea.vmem [#allocation7], %s855_s5 }
  0x59   : > { %479 = vmatpush3.bf16.msra.mxu0 %v478_v5  ;;  %v347_v37 = vld [vmem:[%s925_s3] sm:$0x3]  ;;  %s371_s23 = sshll.u32 %s227_s9, 4  ;;  %s878_s29 = scalar_lea.hbm %s926_s4, %s455_s22  ;;  %s880_s23 = int_to_ptr.vmem [resolvable:$true] %s371_s23 }
  0x5a   : > { %480 = vmatprep.subr.bf16.mxu0 %v690_v0  ;;  %v354_v44 = vrot.slane %v347_v37, 1  ;;  %p945_p10 = scmp.ne.s32.totalorder %s934_s27, 0  ;;  %s693_s19 = smov [#allocation7]  }
  0x5b   : > { %s618_s20 = sshll.u32 %s693_s19, 4  ;;  %s619_s20 = int_to_ptr.vmem [resolvable:$false] %s618_s20 }
  0x5c   : > { %s620_s6 = scalar_lea.vmem %s619_s20, 32  ;;  %p621_p5 = scmp.lt.s32.totalorder %s880_s23, %s619_s20 }
  0x5d   : > { %482 = vmatpush3.bf16.msra.mxu0 %v481_v7 }
  0x5e   : > { %472 = vmatprep.subr.mxu0 %v692_v1 }
  0x61   : > { %473 = vmatpush3.msra.mxu0 %v232_v8 }
  0x62   : > { %475 = vmatmul.mubr.msk.f32.vlgmr.msra.gmra.mrb[0].mxu0 %vm234_vm1, %v233_v9 }
 0x135   : > { %v304_v11 = vpop.f32.mrb[0].mxu0 }
 0x136   : > { %v339_v12 = vmul.f32 %v338_v10, %v304_v11  ;;  %v476_v13 = vpop.f32.mrb[1].mxu0  ;;  %v309_v14 = vsel %vm308_vm2, %v304_v11, 0.0  ;;  %v319_v15 = vmul.f32 %v304_v11, %v304_v11 }
 0x137   : > { %310 = vadd.xlane.f32.xlu0 %v309_v14 }
 0x138   : > { %v340_v16 = vsel %vm308_vm2, %v339_v12, 0.0  ;;  %v320_v17 = vsel %vm308_vm2, %v319_v15, 0.0 }
 0x139   : > { %v341_v32 = vrot.slane %v340_v16, 4 }
 0x13b   : > { %321 = vadd.xlane.f32.xlu0 %v320_v17  ;;  %v342_v33 = vadd.f32 %v341_v32, %v340_v16 }
 0x13d   : > { %v343_v34 = vrot.slane %v342_v33, 2 }
 0x13f   : > { %v344_v35 = vadd.f32 %v343_v34, %v342_v33 }
 0x141   : > { %v345_v36 = vrot.slane %v344_v35, 1 }
 0x143   : > { %v346_v40 = vadd.f32 %v345_v36, %v344_v35 }
 0x1c4   : > { %v311_v18 = vpop.xlane.xlu0 %310 }
 0x1c5   : > { %v312_v19 = vrot.slane %v311_v18, 4 }
 0x1c7   : > { %v313_v20 = vadd.f32 %v312_v19, %v311_v18 }
 0x1c8   : > { %v322_v21 = vpop.xlane.xlu0 %321 }
 0x1c9   : > { %v314_v22 = vrot.slane %v313_v20, 2  ;;  %v323_v23 = vrot.slane %v322_v21, 4 }
 0x1cb   : > { %v324_v24 = vadd.f32 %v323_v23, %v322_v21  ;;  %v315_v25 = vadd.f32 %v314_v22, %v313_v20 }
 0x1cd   : > { %v325_v26 = vrot.slane %v324_v24, 2  ;;  %v316_v27 = vrot.slane %v315_v25, 1 }
 0x1cf   : > { %v326_v28 = vadd.f32 %v325_v26, %v324_v24  ;;  %v317_v29 = vadd.f32 %v316_v27, %v315_v25 }
 0x1d1   : > { %486 = vpush %v317_v29  ;;  %v327_v30 = vrot.slane %v326_v28, 1 }
 0x1d3   : > { %v328_v31 = vadd.f32 %v327_v30, %v326_v28 }
 0x1d5   : > { %488 = vpush %v328_v31 }
 0x202   : > { %s487_s8 = spop %486 }
 0x203   : > { %s330_s12 = smul.f32 0.015625, %s487_s8  ;;  %s359_s8 = scalar_lea.sflag [#allocation4], %s855_s5 }
 0x205   : > { %v348_v38 = vstv %s330_s12  ;;  %s332_s30 = smul.f32 %s330_s12, %s330_s12  ;;  %s614_s12 = scalar_lea.vmem %s880_s23, 16 }
 0x206   : > { %v349_v39 = vmul.f32 %v348_v38, %v347_v37  ;;  %s489_s7 = spop %488  ;;  %p615_p9 = scmp.ne.s32.totalorder %s880_s23, %s614_s12 }
 0x207   : > { %s331_s10 = smul.f32 0.015625, %s489_s7  ;;  %p622_p0 = scmp.lt.s32.totalorder %s620_s6, %s614_s12 }
 0x208   : > { %v350_v41 = vsub.f32 %v346_v40, %v349_v39  ;;  %p616_p2 = pnand %p615_p9, %p945_p10 }
 0x209   : > { %s333_s11 = ssub.f32 %s331_s10, %s332_s30  ;;  %p623_p6 = por %p622_p0, %p621_p5 }
 0x20a   : > { %p617_p4 = pneg %p616_p2 }
 0x20b   : > { %s334_s13 = sadd.f32 1e-05, %s333_s11 }
 0x20c   : > { %p624_p13 = pnand %p623_p6, %p617_p4 }
 0x20d   : > { %v335_v42 = vstv %s334_s13 }
 0x20e   : > { %554 = vrsqrt.f32 %v335_v42 }
 0x218   : > { %v555_v43 = vpop.eup %554 }
 0x219   : > { %490 = vpush %v555_v43 }
 0x24a   : > { %s491_s14 = spop %490 }
 0x24b   : > { %v351_v45 = vstv %s491_s14 }
 0x24c   : > { %v352_v46 = vmul.f32 %v351_v45, %v350_v41 }
 0x24e   : > { %v356_v47 = vadd.f32 %v354_v44, %v352_v46 }
 0x250   : > { %357 = vst [vmem:[%s227_s9] sm:$0x1] %v356_v47 }
 0x251   : > { %627 = shalt.err (!%p624_p13)
}
 0x252   : > { %s628_s5 = scalar_lea.hbm %s878_s29, 16  ;;  %s632_s10 = scalar_lea.hbm %s926_s4, 32 }
 0x253   : > { %p629_p7 = scmp.ne.s32.totalorder %s878_s29, %s628_s5  ;;  %p633_p1 = scmp.lt.u32.totalorder %s878_s29, %s926_s4 }
 0x254   : > { %p634_p8 = scmp.lt.u32.totalorder %s632_s10, %s628_s5  ;;  %p636_p9 = scmp.lt.u32.totalorder %s628_s5, %s878_s29 }
 0x255   : > { %p630_p3 = pnand %p629_p7, %p945_p10 }
 0x256   : > { %p635_p11 = por %p634_p8, %p633_p1 }
 0x257   : > { %p631_p12 = pneg %p630_p3 }
 0x258   : > { %p637_p2 = por %p636_p9, %p635_p11 }
 0x25a   : > { %p638_p4 = pnand %p637_p2, %p631_p12 }
 0x25c   : > { %641 = shalt.err (!%p638_p4)
}
 0x25d   : > { %498 = dma.vmem_to_hbm [thread:$0]  (%p945_p10), %s880_s23, 16, %s878_s29, %s359_s8  }
 0x25e PF: > { %s383_s14 = sand.u32 1, %s672_s15   ;;  %p946_p5 = scmp.ne.s32.totalorder %s935_s28, 0 }
 0x25f   : > { %p947_p0 = scmp.ge.s32.totalorder %s684_s18, 2  ;;  %s384_s22 = scalar_lea.sflag [#allocation4], %s383_s14 }
 0x261   : > { %p509_p6 = pnand %p947_p0, %p946_p5 }
 0x263   : > { %667 = dma.done.wait (!%p509_p6), %s384_s22, 16  }
 0x264   : > { %669 = vsyncadd (!%p509_p6), %s384_s22, 4294967280  ;;  %p18_p13 = scmp.ge.s32.totalorder %s744_s21, 4   ;;  %s948_s15 = smov %s676_s16 }
 0x265   : > { %s949_s16 = smov %s680_s17  ;;  %s950_s17 = smov %s756_s24 }
 0x266   : > { %s951_s18 = smov %s744_s21  ;;  %20 = sbr.rel (!%p18_p13) target bundleno = 6 (0x6), region = 85 }
 0x26d   :  { %388 = vsyncpa [#allocation3], 1 }
 0x26e   :  { %390 = vsyncpa [#allocation3 + $0x1], 1 }
 0x26f   :  { %391 = vsyncpa [#allocation6], 1 }
 0x270   :  { %392 = vsyncpa [#allocation4], 1 }
 0x271   :  { %394 = vsyncpa [#allocation4 + $0x1], 1 }

</bundles_post_ra>
